<compile_context>
chip_gen: v6e
topology: v6e:2x2x1
jax: 0.10.0
libtpu: 0.0.40
codegen_flags: <defaults>
</compile_context>

<pallas_src>
import jax
import jax.numpy as jnp
from jax.experimental import pallas as pl
from jax.experimental.pallas import tpu as pltpu


def _round_up(x, m):
    return ((x + m - 1) // m) * m


def _mlp_kernel(ab_ids_ref, ag_ids_ref,
                ab_emb_ref, ag_emb_ref,
                w1a_ref, w1b_ref, b1_ref,
                w2_ref, b2_ref,
                w3_ref, b3_ref,
                out_ref):
    """Fused gather + concat + MLP, batch on the lane axis (transposed math).

      x_t   = concat_feature.T                        (D , tile)
      h1_t  = relu(W1.T @ x_t + b1)                   (H1, tile)
      h2_t  = relu(W2.T @ h1_t + b2)                  (H2, tile)
      out_t = sum(h2_t * w3, axis=0) + b3             (1 , tile)  lane-dense
    """
    tile = out_ref.shape[-1]
    num_ab = ab_emb_ref.shape[1]
    num_ag = ag_emb_ref.shape[1]

    ab_ids = ab_ids_ref[0]      # (1, tile) int32, lane-dense
    ag_ids = ag_ids_ref[0]      # (1, tile) int32

    # Embedding gather fused in-kernel as an exact one-hot matmul (each column
    # selects one table row with weight 1.0), executed on the MXU.
    iota_ab = jax.lax.broadcasted_iota(jnp.int32, (num_ab, tile), 0)
    iota_ag = jax.lax.broadcasted_iota(jnp.int32, (num_ag, tile), 0)
    onehot_ab = jnp.where(iota_ab == ab_ids, 1.0, 0.0).astype(jnp.float32)
    onehot_ag = jnp.where(iota_ag == ag_ids, 1.0, 0.0).astype(jnp.float32)

    x_ab = jnp.dot(ab_emb_ref[...], onehot_ab,
                   preferred_element_type=jnp.float32)   # (d_ab, tile)
    x_ag = jnp.dot(ag_emb_ref[...], onehot_ag,
                   preferred_element_type=jnp.float32)   # (d_ag, tile)

    # Layer 0 (+ReLU). The concat is folded away:
    #   x @ W1 == x_ab @ W1[:d_ab] + x_ag @ W1[d_ab:]
    h1 = (jnp.dot(w1a_ref[...], x_ab, preferred_element_type=jnp.float32)
          + jnp.dot(w1b_ref[...], x_ag, preferred_element_type=jnp.float32)
          + b1_ref[...])
    h1 = jnp.maximum(h1, 0.0)

    # Layer 1 (+ReLU).
    h2 = jnp.dot(w2_ref[...], h1, preferred_element_type=jnp.float32) + b2_ref[...]
    h2 = jnp.maximum(h2, 0.0)

    # Layer 2 (out_features == 1): VPU multiply + sublane reduction; the result
    # is already lane-dense (1, tile) -> unmasked vector store.
    out = jnp.sum(h2 * w3_ref[...], axis=0, keepdims=True) + b3_ref[...]
    out_ref[0] = out.astype(out_ref.dtype)


def predictor_forward(ab_id, ag_id, ab_embedding, ag_embedding, params,
                      *, batch_tile=512):
    """Predictor.forward: embedding gather + concat + 3-layer MLP (ReLU on 0,1).

    Everything runs inside one Pallas kernel. The batch is padded to a multiple
    of 128 and mapped to the lane axis. Returns shape (B, 1) float32.
    """
    w1, b1, w2, b2, w3, b3 = (jnp.asarray(p, jnp.float32) for p in params)
    ab_embedding = jnp.asarray(ab_embedding, jnp.float32)
    ag_embedding = jnp.asarray(ag_embedding, jnp.float32)

    d_ab = ab_embedding.shape[1]
    d_ag = ag_embedding.shape[1]
    h1_dim = w1.shape[1]
    h2_dim = w2.shape[1]
    assert w1.shape[0] == d_ab + d_ag and w3.shape[1] == 1

    B = ab_id.shape[0]
    # Lane-dense batch tiling: tile is a multiple of 128, as large as useful.
    tile = _round_up(min(batch_tile, _round_up(B, 128)), 128)
    # Prefer >= 2 grid steps when B allows it (feeds both megacore TCs).
    if _round_up(B, tile) // tile < 2 and tile > 128:
        tile = max(128, _round_up(-(-B // 2), 128))
    b_pad = _round_up(B, tile)
    n_tiles = b_pad // tile

    # Pad ids with 0 (a valid row); padded rows are sliced off at the end.
    ab_ids = jnp.zeros((b_pad,), jnp.int32).at[:B].set(ab_id.astype(jnp.int32))
    ag_ids = jnp.zeros((b_pad,), jnp.int32).at[:B].set(ag_id.astype(jnp.int32))
    ab_ids = ab_ids.reshape(n_tiles, 1, tile)
    ag_ids = ag_ids.reshape(n_tiles, 1, tile)

    # One-time transposed parameter prep (layout plumbing outside the kernel).
    ab_emb_t = ab_embedding.T                                  # (d_ab, num_ab)
    ag_emb_t = ag_embedding.T                                  # (d_ag, num_ag)
    w1a_t = w1[:d_ab].T                                        # (H1, d_ab)
    w1b_t = w1[d_ab:].T                                        # (H1, d_ag)
    b1_c = b1.reshape(h1_dim, 1)
    w2_t = w2.T                                                # (H2, H1)
    b2_c = b2.reshape(h2_dim, 1)
    w3_c = w3.reshape(h2_dim, 1)
    b3_c = b3.reshape(1, 1)

    resident = lambda i: (0, 0)
    flops_per_tile = 2 * tile * (ab_emb_t.shape[1] * d_ab
                                 + ag_emb_t.shape[1] * d_ag
                                 + (d_ab + d_ag) * h1_dim
                                 + h1_dim * h2_dim
                                 + h2_dim)
    weight_bytes = sum(int(a.size) * 4 for a in
                       (ab_emb_t, ag_emb_t, w1a_t, w1b_t, b1_c,
                        w2_t, b2_c, w3_c, b3_c))

    out = pl.pallas_call(
        _mlp_kernel,
        out_shape=jax.ShapeDtypeStruct((n_tiles, 1, tile), jnp.float32),
        grid_spec=pltpu.PrefetchScalarGridSpec(
            num_scalar_prefetch=0,
            grid=(n_tiles,),
            in_specs=[
                pl.BlockSpec((1, 1, tile), lambda i: (i, 0, 0)),   # ab ids
                pl.BlockSpec((1, 1, tile), lambda i: (i, 0, 0)),   # ag ids
                pl.BlockSpec(ab_emb_t.shape, resident),            # ab emb.T
                pl.BlockSpec(ag_emb_t.shape, resident),            # ag emb.T
                pl.BlockSpec(w1a_t.shape, resident),               # W1[:d_ab].T
                pl.BlockSpec(w1b_t.shape, resident),               # W1[d_ab:].T
                pl.BlockSpec(b1_c.shape, resident),                # b1 column
                pl.BlockSpec(w2_t.shape, resident),                # W2.T
                pl.BlockSpec(b2_c.shape, resident),                # b2 column
                pl.BlockSpec(w3_c.shape, resident),                # w3 column
                pl.BlockSpec(b3_c.shape, resident),                # b3 scalar
            ],
            out_specs=pl.BlockSpec((1, 1, tile), lambda i: (i, 0, 0)),
        ),
        compiler_params=pltpu.CompilerParams(
            dimension_semantics=("parallel",)),
        cost_estimate=pl.CostEstimate(
            flops=n_tiles * flops_per_tile,
            transcendentals=0,
            bytes_accessed=weight_bytes + 3 * b_pad * 4),
    )(ab_ids, ag_ids, ab_emb_t, ag_emb_t,
      w1a_t, w1b_t, b1_c, w2_t, b2_c, w3_c, b3_c)

    # (n_tiles, 1, tile) -> (B, 1); padded rows sliced off.
    return out.reshape(b_pad, 1)[:B]


def _init_linear(key, fan_in, fan_out):
    """Deterministic init matching torch.nn.Linear's U(-1/sqrt(fan_in), ...)."""
    kw, kb = jax.random.split(key)
    bound = 1.0 / jnp.sqrt(jnp.float32(fan_in))
    w = jax.random.uniform(kw, (fan_in, fan_out), jnp.float32, -bound, bound)
    b = jax.random.uniform(kb, (1, fan_out), jnp.float32, -bound, bound)
    return w, b


if __name__ == "__main__":
    key = jax.random.PRNGKey(0)
    k_ab, k_ag, k_id1, k_id2, k_l1, k_l2, k_l3 = jax.random.split(key, 7)

    # Small synthetic problem.
    num_ab, num_ag = 16, 16
    d_ab, d_ag = 16, 16
    batch = 8

    # mlp_layers_dim = [d_ab + d_ag, 64, 32, 1]
    mlp_layers_dim = [d_ab + d_ag, 64, 32, 1]

    ab_embedding = jax.random.normal(k_ab, (num_ab, d_ab), jnp.float32)
    ag_embedding = jax.random.normal(k_ag, (num_ag, d_ag), jnp.float32)
    ab_id = jax.random.randint(k_id1, (batch,), 0, num_ab)   # data.drug_id
    ag_id = jax.random.randint(k_id2, (batch,), 0, num_ag)   # data.target_id

    w1, b1 = _init_linear(k_l1, mlp_layers_dim[0], mlp_layers_dim[1])
    w2, b2 = _init_linear(k_l2, mlp_layers_dim[1], mlp_layers_dim[2])
    w3, b3 = _init_linear(k_l3, mlp_layers_dim[2], mlp_layers_dim[3])
    params = (w1, b1, w2, b2, w3, b3)

    pred = predictor_forward(ab_id, ag_id, ab_embedding, ag_embedding, params)
    pred = jax.block_until_ready(pred)

    # Pure-JAX reference for sanity (final dot at highest precision since the
    # kernel computes the last layer as an exact f32 multiply+reduce).
    ab_f = ab_embedding[ab_id]
    ag_f = ag_embedding[ag_id]
    x = jnp.concatenate([ab_f, ag_f], axis=1)
    h1 = jnp.maximum(x @ w1 + b1, 0.0)
    h2 = jnp.maximum(h1 @ w2 + b2, 0.0)
    ref = jnp.dot(h2, w3, precision=jax.lax.Precision.HIGHEST) + b3

    assert pred.shape == (batch, 1)
    assert jnp.allclose(pred, ref, atol=1e-4, rtol=1e-4)

    print("KERNEL_OK")
</pallas_src>

<mosaic_0001>
module attributes {stable_mosaic.version = 11 : i64} {
  func.func @_mlp_kernel(%arg0: i32, %arg1: memref<1x1x128xi32, #tpu.memory_space<vmem>>, %arg2: memref<1x1x128xi32, #tpu.memory_space<vmem>>, %arg3: memref<16x16xf32, #tpu.memory_space<vmem>>, %arg4: memref<16x16xf32, #tpu.memory_space<vmem>>, %arg5: memref<64x16xf32, #tpu.memory_space<vmem>>, %arg6: memref<64x16xf32, #tpu.memory_space<vmem>>, %arg7: memref<64x1xf32, #tpu.memory_space<vmem>>, %arg8: memref<32x64xf32, #tpu.memory_space<vmem>>, %arg9: memref<32x1xf32, #tpu.memory_space<vmem>>, %arg10: memref<32x1xf32, #tpu.memory_space<vmem>>, %arg11: memref<1x1xf32, #tpu.memory_space<vmem>>, %arg12: memref<1x1x128xf32, #tpu.memory_space<vmem>>) attributes {dimension_semantics = [#tpu.dimension_semantics<parallel>], iteration_bounds = array<i64: 1>, scalar_prefetch = 0 : i64, scratch_operands = 0 : i64, tpu.core_type = #tpu.core_type<tc>, window_params = [{transform_indices = @transform_0, window_bounds = array<i64: 1, 1, 128>}, {transform_indices = @transform_1, window_bounds = array<i64: 1, 1, 128>}, {pipeline_mode = #tpu.pipeline_mode<synchronous>, transform_indices = @transform_2, window_bounds = array<i64: 16, 16>}, {pipeline_mode = #tpu.pipeline_mode<synchronous>, transform_indices = @transform_3, window_bounds = array<i64: 16, 16>}, {pipeline_mode = #tpu.pipeline_mode<synchronous>, transform_indices = @transform_4, window_bounds = array<i64: 64, 16>}, {pipeline_mode = #tpu.pipeline_mode<synchronous>, transform_indices = @transform_5, window_bounds = array<i64: 64, 16>}, {pipeline_mode = #tpu.pipeline_mode<synchronous>, transform_indices = @transform_6, window_bounds = array<i64: 64, 1>}, {pipeline_mode = #tpu.pipeline_mode<synchronous>, transform_indices = @transform_7, window_bounds = array<i64: 32, 64>}, {pipeline_mode = #tpu.pipeline_mode<synchronous>, transform_indices = @transform_8, window_bounds = array<i64: 32, 1>}, {pipeline_mode = #tpu.pipeline_mode<synchronous>, transform_indices = @transform_9, window_bounds = array<i64: 32, 1>}, {pipeline_mode = #tpu.pipeline_mode<synchronous>, transform_indices = @transform_10, window_bounds = array<i64: 1, 1>}, {transform_indices = @transform_11, window_bounds = array<i64: 1, 1, 128>}]} {
    %c0 = arith.constant 0 : index
    %c0_0 = arith.constant 0 : index
    %c0_1 = arith.constant 0 : index
    %0 = vector.load %arg1[%c0, %c0_0, %c0_1] : memref<1x1x128xi32, #tpu.memory_space<vmem>>, vector<1x1x128xi32>
    %1 = vector.shape_cast %0 : vector<1x1x128xi32> to vector<1x128xi32>
    %c0_2 = arith.constant 0 : index
    %c0_3 = arith.constant 0 : index
    %c0_4 = arith.constant 0 : index
    %2 = vector.load %arg2[%c0_2, %c0_3, %c0_4] : memref<1x1x128xi32, #tpu.memory_space<vmem>>, vector<1x1x128xi32>
    %3 = vector.shape_cast %2 : vector<1x1x128xi32> to vector<1x128xi32>
    %4 = tpu.iota {dimensions = array<i32: 0>} : vector<16x128xi32>
    %5 = tpu.iota {dimensions = array<i32: 0>} : vector<16x128xi32>
    %6 = vector.broadcast %1 : vector<1x128xi32> to vector<16x128xi32>
    %7 = arith.cmpi eq, %4, %6 : vector<16x128xi32>
    %cst = arith.constant 1.000000e+00 : f32
    %cst_5 = arith.constant 0.000000e+00 : f32
    %8 = vector.broadcast %cst : f32 to vector<16x128xf32>
    %9 = vector.broadcast %cst_5 : f32 to vector<16x128xf32>
    %10 = arith.select %7, %8, %9 : vector<16x128xi1>, vector<16x128xf32>
    %11 = vector.broadcast %3 : vector<1x128xi32> to vector<16x128xi32>
    %12 = arith.cmpi eq, %5, %11 : vector<16x128xi32>
    %cst_6 = arith.constant 1.000000e+00 : f32
    %cst_7 = arith.constant 0.000000e+00 : f32
    %13 = vector.broadcast %cst_6 : f32 to vector<16x128xf32>
    %14 = vector.broadcast %cst_7 : f32 to vector<16x128xf32>
    %15 = arith.select %12, %13, %14 : vector<16x128xi1>, vector<16x128xf32>
    %c0_8 = arith.constant 0 : index
    %c0_9 = arith.constant 0 : index
    %16 = vector.load %arg3[%c0_8, %c0_9] : memref<16x16xf32, #tpu.memory_space<vmem>>, vector<16x16xf32>
    %cst_10 = arith.constant dense<0.000000e+00> : vector<16x128xf32>
    %17 = tpu.matmul %16, %10, %cst_10 {dimension_numbers = #tpu.dot_dimension_numbers<[1], [0], [0], [1], [0, 0, 1, 1], [], []>} : vector<16x16xf32>, vector<16x128xf32>, vector<16x128xf32> -> vector<16x128xf32>
    %c0_11 = arith.constant 0 : index
    %c0_12 = arith.constant 0 : index
    %18 = vector.load %arg4[%c0_11, %c0_12] : memref<16x16xf32, #tpu.memory_space<vmem>>, vector<16x16xf32>
    %cst_13 = arith.constant dense<0.000000e+00> : vector<16x128xf32>
    %19 = tpu.matmul %18, %15, %cst_13 {dimension_numbers = #tpu.dot_dimension_numbers<[1], [0], [0], [1], [0, 0, 1, 1], [], []>} : vector<16x16xf32>, vector<16x128xf32>, vector<16x128xf32> -> vector<16x128xf32>
    %c0_14 = arith.constant 0 : index
    %c0_15 = arith.constant 0 : index
    %20 = vector.load %arg5[%c0_14, %c0_15] : memref<64x16xf32, #tpu.memory_space<vmem>>, vector<64x16xf32>
    %cst_16 = arith.constant dense<0.000000e+00> : vector<64x128xf32>
    %21 = tpu.matmul %20, %17, %cst_16 {dimension_numbers = #tpu.dot_dimension_numbers<[1], [0], [0], [1], [0, 0, 1, 1], [], []>} : vector<64x16xf32>, vector<16x128xf32>, vector<64x128xf32> -> vector<64x128xf32>
    %c0_17 = arith.constant 0 : index
    %c0_18 = arith.constant 0 : index
    %22 = vector.load %arg6[%c0_17, %c0_18] : memref<64x16xf32, #tpu.memory_space<vmem>>, vector<64x16xf32>
    %cst_19 = arith.constant dense<0.000000e+00> : vector<64x128xf32>
    %23 = tpu.matmul %22, %19, %cst_19 {dimension_numbers = #tpu.dot_dimension_numbers<[1], [0], [0], [1], [0, 0, 1, 1], [], []>} : vector<64x16xf32>, vector<16x128xf32>, vector<64x128xf32> -> vector<64x128xf32>
    %24 = arith.addf %21, %23 : vector<64x128xf32>
    %c0_20 = arith.constant 0 : index
    %c0_21 = arith.constant 0 : index
    %25 = vector.load %arg7[%c0_20, %c0_21] : memref<64x1xf32, #tpu.memory_space<vmem>>, vector<64x1xf32>
    %26 = vector.broadcast %25 : vector<64x1xf32> to vector<64x128xf32>
    %27 = arith.addf %24, %26 : vector<64x128xf32>
    %cst_22 = arith.constant 0.000000e+00 : f32
    %28 = vector.broadcast %cst_22 : f32 to vector<64x128xf32>
    %29 = arith.maximumf %27, %28 : vector<64x128xf32>
    %c0_23 = arith.constant 0 : index
    %c0_24 = arith.constant 0 : index
    %30 = vector.load %arg8[%c0_23, %c0_24] : memref<32x64xf32, #tpu.memory_space<vmem>>, vector<32x64xf32>
    %cst_25 = arith.constant dense<0.000000e+00> : vector<32x128xf32>
    %31 = tpu.matmul %30, %29, %cst_25 {dimension_numbers = #tpu.dot_dimension_numbers<[1], [0], [0], [1], [0, 0, 1, 1], [], []>} : vector<32x64xf32>, vector<64x128xf32>, vector<32x128xf32> -> vector<32x128xf32>
    %c0_26 = arith.constant 0 : index
    %c0_27 = arith.constant 0 : index
    %32 = vector.load %arg9[%c0_26, %c0_27] : memref<32x1xf32, #tpu.memory_space<vmem>>, vector<32x1xf32>
    %33 = vector.broadcast %32 : vector<32x1xf32> to vector<32x128xf32>
    %34 = arith.addf %31, %33 : vector<32x128xf32>
    %cst_28 = arith.constant 0.000000e+00 : f32
    %35 = vector.broadcast %cst_28 : f32 to vector<32x128xf32>
    %36 = arith.maximumf %34, %35 : vector<32x128xf32>
    %c0_29 = arith.constant 0 : index
    %c0_30 = arith.constant 0 : index
    %37 = vector.load %arg10[%c0_29, %c0_30] : memref<32x1xf32, #tpu.memory_space<vmem>>, vector<32x1xf32>
    %38 = vector.broadcast %37 : vector<32x1xf32> to vector<32x128xf32>
    %39 = arith.mulf %36, %38 : vector<32x128xf32>
    %cst_31 = arith.constant dense<0.000000e+00> : vector<128xf32>
    %40 = vector.multi_reduction <add>, %39, %cst_31 [0] : vector<32x128xf32> to vector<128xf32>
    %41 = vector.shape_cast %40 : vector<128xf32> to vector<1x128xf32>
    %c0_32 = arith.constant 0 : index
    %c0_33 = arith.constant 0 : index
    %42 = vector.load %arg11[%c0_32, %c0_33] : memref<1x1xf32, #tpu.memory_space<vmem>>, vector<1x1xf32>
    %43 = vector.broadcast %42 : vector<1x1xf32> to vector<1x128xf32>
    %44 = arith.addf %41, %43 : vector<1x128xf32>
    %c0_34 = arith.constant 0 : index
    %c0_35 = arith.constant 0 : index
    %c0_36 = arith.constant 0 : index
    %45 = vector.load %arg12[%c0_34, %c0_35, %c0_36] : memref<1x1x128xf32, #tpu.memory_space<vmem>>, vector<1x1x128xf32>
    %46 = vector.shape_cast %45 : vector<1x1x128xf32> to vector<1x128xf32>
    %47 = vector.shape_cast %44 : vector<1x128xf32> to vector<1x1x128xf32>
    tpu.vector_store %arg12[%c0_34, %c0_35, %c0_36], %47 {strides = array<i32>} : memref<1x1x128xf32, #tpu.memory_space<vmem>>, vector<1x1x128xf32>,
    return
  }
  func.func @transform_0(%arg0: i32) -> (i32, i32, i32) {
    %c0_i32 = arith.constant 0 : i32
    %c0_i32_0 = arith.constant 0 : i32
    %c0_i32_1 = arith.constant 0 : i32
    return %arg0, %c0_i32, %c0_i32_0 : i32, i32, i32
  }
  func.func @transform_1(%arg0: i32) -> (i32, i32, i32) {
    %c0_i32 = arith.constant 0 : i32
    %c0_i32_0 = arith.constant 0 : i32
    %c0_i32_1 = arith.constant 0 : i32
    return %arg0, %c0_i32, %c0_i32_0 : i32, i32, i32
  }
  func.func @transform_2(%arg0: i32) -> (i32, i32) {
    %c0_i32 = arith.constant 0 : i32
    %c0_i32_0 = arith.constant 0 : i32
    %c0_i32_1 = arith.constant 0 : i32
    return %c0_i32, %c0_i32_0 : i32, i32
  }
  func.func @transform_3(%arg0: i32) -> (i32, i32) {
    %c0_i32 = arith.constant 0 : i32
    %c0_i32_0 = arith.constant 0 : i32
    %c0_i32_1 = arith.constant 0 : i32
    return %c0_i32, %c0_i32_0 : i32, i32
  }
  func.func @transform_4(%arg0: i32) -> (i32, i32) {
    %c0_i32 = arith.constant 0 : i32
    %c0_i32_0 = arith.constant 0 : i32
    %c0_i32_1 = arith.constant 0 : i32
    return %c0_i32, %c0_i32_0 : i32, i32
  }
  func.func @transform_5(%arg0: i32) -> (i32, i32) {
    %c0_i32 = arith.constant 0 : i32
    %c0_i32_0 = arith.constant 0 : i32
    %c0_i32_1 = arith.constant 0 : i32
    return %c0_i32, %c0_i32_0 : i32, i32
  }
  func.func @transform_6(%arg0: i32) -> (i32, i32) {
    %c0_i32 = arith.constant 0 : i32
    %c0_i32_0 = arith.constant 0 : i32
    %c0_i32_1 = arith.constant 0 : i32
    return %c0_i32, %c0_i32_0 : i32, i32
  }
  func.func @transform_7(%arg0: i32) -> (i32, i32) {
    %c0_i32 = arith.constant 0 : i32
    %c0_i32_0 = arith.constant 0 : i32
    %c0_i32_1 = arith.constant 0 : i32
    return %c0_i32, %c0_i32_0 : i32, i32
  }
  func.func @transform_8(%arg0: i32) -> (i32, i32) {
    %c0_i32 = arith.constant 0 : i32
    %c0_i32_0 = arith.constant 0 : i32
    %c0_i32_1 = arith.constant 0 : i32
    return %c0_i32, %c0_i32_0 : i32, i32
  }
  func.func @transform_9(%arg0: i32) -> (i32, i32) {
    %c0_i32 = arith.constant 0 : i32
    %c0_i32_0 = arith.constant 0 : i32
    %c0_i32_1 = arith.constant 0 : i32
    return %c0_i32, %c0_i32_0 : i32, i32
  }
  func.func @transform_10(%arg0: i32) -> (i32, i32) {
    %c0_i32 = arith.constant 0 : i32
    %c0_i32_0 = arith.constant 0 : i32
    %c0_i32_1 = arith.constant 0 : i32
    return %c0_i32, %c0_i32_0 : i32, i32
  }
  func.func @transform_11(%arg0: i32) -> (i32, i32, i32) {
    %c0_i32 = arith.constant 0 : i32
    %c0_i32_0 = arith.constant 0 : i32
    %c0_i32_1 = arith.constant 0 : i32
    return %arg0, %c0_i32, %c0_i32_0 : i32, i32, i32
  }
}

</mosaic_0001>

<bundles_post_ra>
// kernel: tpu_custom_call.1
= control target key start
LH: loop header
LB: loop body
LE: loop exit
PB: predicated region body
PF: predicated region fallthrough
CT: control target
= control target key end

     0   :  { %s1150_s0 = inlined_call_operand.vmem [shape: s32[1,1,128], index: 0, kind: input, shape index: {}]   ;;  %s1151_s1 = inlined_call_operand.vmem [shape: s32[1,1,128], index: 1, kind: input, shape index: {}]   ;;  %s1152_s2 = inlined_call_operand.vmem [shape: f32[16,16], index: 2, kind: input, shape index: {}]   ;;  %s1153_s3 = inlined_call_operand.vmem [shape: f32[16,16], index: 3, kind: input, shape index: {}]   ;;  %s1154_s4 = inlined_call_operand.vmem [shape: f32[64,16], index: 4, kind: input, shape index: {}]   ;;  %s1155_s5 = inlined_call_operand.vmem [shape: f32[64,16], index: 5, kind: input, shape index: {}]   ;;  %s1156_s6 = inlined_call_operand.vmem [shape: f32[64,1], index: 6, kind: input, shape index: {}]   ;;  %s1157_s7 = inlined_call_operand.vmem [shape: f32[32,64], index: 7, kind: input, shape index: {}]   ;;  %s1158_s8 = inlined_call_operand.vmem [shape: f32[32,1], index: 8, kind: input, shape index: {}]   ;;  %s1159_s9 = inlined_call_operand.vmem [shape: f32[32,1], index: 9, kind: input, shape index: {}]   ;;  %s1160_s10 = inlined_call_operand.<no memory space> [shape: f32[1,1], index: 10, kind: input, shape index: {}]   ;;  %s1161_s11 = inlined_call_operand.hbm [shape: f32[1,1,128], index: 11, kind: output, shape index: {}]  }
   0x1   :  { %v16_v0 = vstv %s1160_s10 }
   0x2   :  { %17 = vst [vmem:[#allocation2] sm:$0x1] %v16_v0 }
   0x3   :  { %v43_v1 = vlaneseq  ;;  %v62_v2 = vld [vmem:[%s1152_s2] sm:$0xff]  ;;  %vm64_vm0 = vcmask 130048  }
   0x4   :  { %834 = vmatprep.mubr.msk.f32.mxu1 %vm64_vm0, %v62_v2 }
   0x5   :  { %v995_v3 = vshrl.u32 %v43_v1, 7 }
   0x6   :  { %18 = vsyncpa [#allocation4], 0  ;;  %v760_v4 = vld [vmem:[%s1150_s0] ss:$0 sm:$0xff]  ;;  %v925_v7 = vmov 1.0   ;;  %v63_v8 = vld [vmem:[%s1152_s2 + $0x8] sm:$0xff] }
   0x7   :  { %v45_v5 = vadd.s32 8, %v995_v3  ;;  %v761_v6 = vld [vmem:[%s1151_s1] ss:$0 sm:$0xff]  ;;  %vm50_vm1 = vcmp.eq.s32.totalorder %v995_v3, %v760_v4  ;;  %v147_v10 = vld [vmem:[%s1153_s3 + $0x8] sm:$0xff]  ;;  %v510_v13 = vld [vmem:[%s1156_s6 + $0x38] sm:$0xff]  ;;  %v926_v15 = vmov 0  }
   0x8   :  { %v146_v9 = vld [vmem:[%s1153_s3] sm:$0xff]  ;;  %vm58_vm4 = vcmp.eq.s32.totalorder %v995_v3, %v761_v6  ;;  %v508_v14 = vld [vmem:[%s1156_s6 + $0x28] sm:$0xff]  ;;  %901 = vset.pattern.permute.xlu0 %v926_v15  ;;  %902 = vset.pattern.permute.xlu1 %v926_v15  ;;  %v509_v16 = vld [vmem:[%s1156_s6 + $0x30] sm:$0xff]  ;;  %vm595_vm5 = vcmask 523264  }
   0x9   :  { %vm51_vm2 = vcmp.eq.s32.totalorder %v45_v5, %v760_v4  ;;  %vm59_vm3 = vcmp.eq.s32.totalorder %v45_v5, %v761_v6  ;;  %v229_v11 = vld [vmem:[%s1154_s4] sm:$0xff]  ;;  %548 = vperm.xlu0 %901, %v510_v13   ;;  %538 = vperm.xlu1 %902, %v508_v14   ;;  %v506_v18 = vld [vmem:[%s1156_s6 + $0x18] sm:$0xff]  ;;  %v505_v19 = vld [vmem:[%s1156_s6 + $0x10] sm:$0xff] }
   0xa   :  { %830 = vmatprep.subr.msk.mxu1 %vm51_vm2, %v925_v7  ;;  %v237_v12 = vld [vmem:[%s1155_s5] sm:$0xff]  ;;  %v504_v20 = vld [vmem:[%s1156_s6 + $0x8] sm:$0xff]  ;;  %v573_v24 = vld [vmem:[%s1158_s8 + $0x10] sm:$0xff] }
   0xb   :  { %831 = vmatpush3.msk.msra.mxu1 %vm51_vm2, %v925_v7  ;;  %848 = vmatprep.mubr.msk.f32.mxu0 %vm64_vm0, %v237_v12  ;;  %v507_v17 = vld [vmem:[%s1156_s6 + $0x20] sm:$0xff]  ;;  %v572_v23 = vld [vmem:[%s1158_s8 + $0x8] sm:$0xff]  ;;  %v574_v25 = vld [vmem:[%s1158_s8 + $0x18] sm:$0xff] }
   0xc   :  { %832 = vmatprep.subr.msk.mxu1 %vm50_vm1, %v925_v7  ;;  %v503_v21 = vld [vmem:[%s1156_s6] sm:$0xff]  ;;  %v698_v27 = vld [vmem:[%s1159_s9 + $0x8] sm:$0xff]  ;;  %v699_v28 = vld [vmem:[%s1159_s9 + $0x10] sm:$0xff] }
   0xd   :  { %833 = vmatpush3.msk.msra.mxu1 %vm50_vm1, %v925_v7  ;;  %543 = vperm.xlu0 %901, %v509_v16   ;;  %v571_v22 = vld [vmem:[%s1158_s8] sm:$0xff]  ;;  %v700_v29 = vld [vmem:[%s1159_s9 + $0x18] sm:$0xff]  ;;  %v230_v33 = vld [vmem:[%s1154_s4 + $0x8] sm:$0xff] }
   0xe   :  { %835 = vmatmul.mubr.msk.f32.vlgmr.msra.gmra.mxu1 %vm64_vm0, %v63_v8  ;;  %837 = vmatprep.subr.msk.mxu1 %vm59_vm3, %v925_v7  ;;  %v697_v26 = vld [vmem:[%s1159_s9] sm:$0xff]  ;;  %v231_v34 = vld [vmem:[%s1154_s4 + $0x10] sm:$0xff]  ;;  %v238_v37 = vld [vmem:[%s1155_s5 + $0x8] sm:$0xff] }
   0xf   :  { %838 = vmatpush3.msk.msra.mxu1 %vm59_vm3, %v925_v7  ;;  %841 = vmatprep.mubr.msk.f32.mxu1 %vm64_vm0, %v146_v9  ;;  %v734_v30 = vld [vmem:[#allocation2] sm:$0x1]  ;;  %v232_v38 = vld [vmem:[%s1154_s4 + $0x18] sm:$0xff]  ;;  %v239_v39 = vld [vmem:[%s1155_s5 + $0x10] sm:$0xff] }
  0x10   :  { %839 = vmatprep.subr.msk.mxu1 %vm58_vm4, %v925_v7  ;;  %533 = vperm.xlu1 %902, %v507_v17   ;;  %v233_v40 = vld [vmem:[%s1154_s4 + $0x20] sm:$0xff]  ;;  %v240_v41 = vld [vmem:[%s1155_s5 + $0x18] sm:$0xff]  ;;  %v234_v42 = vld [vmem:[%s1154_s4 + $0x28] sm:$0xff] }
  0x11   :  { %840 = vmatpush3.msk.msra.mxu1 %vm58_vm4, %v925_v7  ;;  %528 = vperm.xlu0 %901, %v506_v18   ;;  %v241_v43 = vld [vmem:[%s1155_s5 + $0x20] sm:$0xff]  ;;  %v235_v44 = vld [vmem:[%s1154_s4 + $0x30] sm:$0xff]  ;;  %v242_v45 = vld [vmem:[%s1155_s5 + $0x28] sm:$0xff] }
  0x12   :  { %842 = vmatmul.mubr.msk.f32.vlgmr.msra.gmra.mxu1 %vm64_vm0, %v147_v10  ;;  %v236_v46 = vld [vmem:[%s1154_s4 + $0x38] sm:$0xff]  ;;  %v243_v47 = vld [vmem:[%s1155_s5 + $0x30] sm:$0xff]  ;;  %v567_v49 = vld [vmem:[%s1157_s7] sm:$0xff] }
  0x13   :  { %864 = vmatprep.mubr.msk.f32.mxu1 %vm64_vm0, %v229_v11  ;;  %v244_v48 = vld [vmem:[%s1155_s5 + $0x38] sm:$0xff] }
  0x14   :  { %523 = vperm.xlu1 %902, %v505_v19  }
  0x15   :  { %518 = vperm.xlu0 %901, %v504_v20  }
  0x18   :  { %513 = vperm.xlu1 %902, %v503_v21  }
  0x19   :  { %577 = vperm.xlu0 %901, %v571_v22  }
  0x1c   :  { %582 = vperm.xlu1 %902, %v572_v23  }
  0x1d   :  { %587 = vperm.xlu0 %901, %v573_v24  }
  0x20   :  { %592 = vperm.xlu1 %902, %v574_v25  }
  0x21   :  { %703 = vperm.xlu0 %901, %v697_v26  }
  0x24   :  { %708 = vperm.xlu1 %902, %v698_v27  }
  0x25   :  { %713 = vperm.xlu0 %901, %v699_v28  }
  0x28   :  { %718 = vperm.xlu1 %902, %v700_v29  }
  0x29   :  { %737 = vperm.xlu0 %901, %v734_v30  }
  0x84   :  { %v549_v58 = vpop.permute.xlu0 %548  ;;  %v539_v61 = vpop.permute.xlu1 %538 }
  0x88   :  { %v544_v1 = vpop.permute.xlu0 %543 }
  0x8b   :  { %v534_v4 = vpop.permute.xlu1 %533 }
  0x8c   :  { %v529_v16 = vpop.permute.xlu0 %528 }
  0x8f   :  { %v524_v20 = vpop.permute.xlu1 %523 }
  0x90   :  { %v519_v27 = vpop.permute.xlu0 %518 }
  0x93   :  { %v514_v30 = vpop.permute.xlu1 %513 }
  0xce   :  { %v836_v31 = vpop.f32.mrf.mxu1 }
  0xcf   :  { %860 = vmatprep.subr.mxu1 %v836_v31 }
  0xd0   :  { %v137_v32 = vpop.f32.mrf.mxu1  ;;  %861 = vmatpush3.msra.mxu1 %v836_v31 }
  0xd1   :  { %862 = vmatprep.subr.mxu1 %v137_v32 }
  0xd2   :  { %v843_v35 = vpop.f32.mrf.mxu1  ;;  %863 = vmatpush3.msra.mxu1 %v137_v32 }
  0xd3   :  { %844 = vmatprep.subr.mxu0 %v843_v35  ;;  %865 = vmatmul.mubr.msk.f32.vlgmr.msra.gmra.mxu1 %vm64_vm0, %v230_v33 }
  0xd4   :  { %v220_v36 = vpop.f32.mrf.mxu1  ;;  %845 = vmatpush3.msra.mxu0 %v843_v35  ;;  %867 = vmatprep.mubr.msk.f32.mxu1 %vm64_vm0, %v231_v34  ;;  %v568_v35 = vld [vmem:[%s1157_s7 + $0x8] sm:$0xff] }
  0xd5   :  { %846 = vmatprep.subr.mxu0 %v220_v36 }
  0xd6   :  { %847 = vmatpush3.msra.mxu0 %v220_v36  ;;  %v569_v36 = vld [vmem:[%s1157_s7 + $0x10] sm:$0xff] }
  0xd7   :  { %849 = vmatmul.mubr.msk.f32.vlgmr.msra.gmra.mxu0 %vm64_vm0, %v238_v37  ;;  %868 = vmatmul.mubr.msk.f32.gmra.mxu1 %vm64_vm0, %v232_v38  ;;  %v570_v37 = vld [vmem:[%s1157_s7 + $0x18] sm:$0xff]  ;;  %v578_v38 = vpop.permute.xlu0 %577  ;;  %s927_s7 = smov [#allocation3]  }
  0xd8   :  { %851 = vmatprep.mubr.msk.f32.mxu0 %vm64_vm0, %v239_v39  ;;  %870 = vmatprep.mubr.msk.f32.mxu1 %vm64_vm0, %v233_v40  ;;  %v583_v39 = vpop.permute.xlu1 %582  ;;  %s752_s23 = sshll.u32 %s927_s7, 4  ;;  %s753_s23 = int_to_ptr.vmem [resolvable:$true] %s752_s23 }
  0xd9   :  { %s903_s10 = scalar_lea.vmem %s753_s23, 16  ;;  %s907_s24 = scalar_lea.vmem %s753_s23, 32 }
  0xda   :  { %p904_p0 = scmp.ne.s32.totalorder %s753_s23, %s903_s10  ;;  %p908_p1 = scmp.lt.s32.totalorder %s753_s23, %s753_s23 }
  0xdb   :  { %852 = vmatmul.mubr.msk.f32.gmra.mxu0 %vm64_vm0, %v240_v41  ;;  %871 = vmatmul.mubr.msk.f32.gmra.mxu1 %vm64_vm0, %v234_v42  ;;  %v588_v40 = vpop.permute.xlu0 %587  ;;  %p909_p2 = scmp.lt.s32.totalorder %s907_s24, %s903_s10 }
  0xdc   :  { %854 = vmatprep.mubr.msk.f32.mxu0 %vm64_vm0, %v241_v43  ;;  %873 = vmatprep.mubr.msk.f32.mxu1 %vm64_vm0, %v235_v44  ;;  %v593_v41 = vpop.permute.xlu1 %592 }
  0xdd   :  { %p910_p3 = por %p909_p2, %p908_p1 }
  0xdf   :  { %855 = vmatmul.mubr.msk.f32.gmra.mxu0 %vm64_vm0, %v242_v45  ;;  %874 = vmatmul.mubr.msk.f32.gmra.mxu1 %vm64_vm0, %v236_v46  ;;  %v704_v46 = vpop.permute.xlu0 %703  ;;  %p911_p4 = pnand %p910_p3, %p904_p0 }
  0xe0   :  { %857 = vmatprep.mubr.msk.f32.mxu0 %vm64_vm0, %v243_v47 }
  0xe3   :  { %858 = vmatmul.mubr.msk.f32.gmra.mxu0 %vm64_vm0, %v244_v48 }
  0xe4   :  { %892 = vmatprep.mubr.msk.f32.mxu0 %vm595_vm5, %v567_v49 }
 0x193   :  { %v866_v50 = vpop.f32.mrf.mxu1 }
 0x195   :  { %v464_v51 = vpop.f32.mrf.mxu1 }
 0x197   :  { %v850_v52 = vpop.f32.mrf.mxu0  ;;  %v869_v53 = vpop.f32.mrf.mxu1 }
 0x198   :  { %v470_v21 = vadd.f32 %v866_v50, %v850_v52 }
 0x199   :  { %v335_v54 = vpop.f32.mrf.mxu0  ;;  %v474_v55 = vpop.f32.mrf.mxu1 }
 0x19a   :  { %v465_v24 = vadd.f32 %v464_v51, %v335_v54  ;;  %v552_v28 = vadd.f32 %v519_v27, %v470_v21  ;;  %v709_v51 = vpop.permute.xlu1 %708 }
 0x19b   :  { %v853_v56 = vpop.f32.mrf.mxu0  ;;  %v872_v57 = vpop.f32.mrf.mxu1 }
 0x19c   :  { %v480_v12 = vadd.f32 %v869_v53, %v853_v56  ;;  %v551_v31 = vadd.f32 %v514_v30, %v465_v24  ;;  %v560_v33 = vmax.f32 %v552_v28, 0.0 }
 0x19d   :  { %v345_v59 = vpop.f32.mrf.mxu0  ;;  %v484_v60 = vpop.f32.mrf.mxu1 }
 0x19e   :  { %v475_v17 = vadd.f32 %v474_v55, %v345_v59  ;;  %v554_v22 = vadd.f32 %v529_v16, %v480_v12  ;;  %v559_v34 = vmax.f32 %v551_v31, 0.0 }
 0x19f   :  { %v856_v62 = vpop.f32.mrf.mxu0  ;;  %v875_v0 = vpop.f32.mrf.mxu1 }
 0x1a0   :  { %v490_v5 = vadd.f32 %v872_v57, %v856_v62  ;;  %v553_v25 = vadd.f32 %v524_v20, %v475_v17  ;;  %v562_v29 = vmax.f32 %v554_v22, 0.0 }
 0x1a1   :  { %v355_v63 = vpop.f32.mrf.mxu0  ;;  %v494_v7 = vpop.f32.mrf.mxu1 }
 0x1a2   :  { %v485_v9 = vadd.f32 %v484_v60, %v355_v63  ;;  %v556_v13 = vadd.f32 %v539_v61, %v490_v5  ;;  %v561_v32 = vmax.f32 %v553_v25, 0.0  ;;  %v719_v61 = vpop.permute.xlu1 %718  ;;  %v742_v5 = vsub.s32 0, %v995_v3 }
 0x1a3   :  { %v859_v2 = vpop.f32.mrf.mxu0 }
 0x1a4   :  { %v500_v6 = vadd.f32 %v875_v0, %v859_v2  ;;  %v555_v18 = vadd.f32 %v534_v4, %v485_v9  ;;  %v564_v23 = vmax.f32 %v556_v13, 0.0 }
 0x1a5   :  { %v365_v8 = vpop.f32.mrf.mxu0 }
 0x1a6   :  { %v558_v10 = vadd.f32 %v549_v58, %v500_v6  ;;  %v495_v11 = vadd.f32 %v494_v7, %v365_v8  ;;  %v563_v26 = vmax.f32 %v555_v18, 0.0  ;;  %v714_v58 = vpop.permute.xlu0 %713 }
 0x1a8   :  { %v566_v14 = vmax.f32 %v558_v10, 0.0  ;;  %v557_v15 = vadd.f32 %v544_v1, %v495_v11 }
 0x1aa   :  { %v565_v19 = vmax.f32 %v557_v15, 0.0  ;;  %876 = vmatprep.subr.mxu0 %v566_v14  ;;  %v738_v7 = vpop.permute.xlu0 %737 }
 0x1ab   :  { %877 = vmatpush3.msra.mxu0 %v566_v14  ;;  %v743_v9 = vrot.slane %v738_v7, %v742_v5 }
 0x1ac   :  { %878 = vmatprep.subr.mxu0 %v565_v19 }
 0x1ad   :  { %879 = vmatpush3.msra.mxu0 %v565_v19 }
 0x1ae   :  { %880 = vmatprep.subr.mxu0 %v564_v23 }
 0x1af   :  { %881 = vmatpush3.msra.mxu0 %v564_v23 }
 0x1b0   :  { %882 = vmatprep.subr.mxu0 %v563_v26 }
 0x1b1   :  { %883 = vmatpush3.msra.mxu0 %v563_v26 }
 0x1b2   :  { %884 = vmatprep.subr.mxu0 %v562_v29 }
 0x1b3   :  { %885 = vmatpush3.msra.mxu0 %v562_v29 }
 0x1b4   :  { %886 = vmatprep.subr.mxu0 %v561_v32 }
 0x1b5   :  { %887 = vmatpush3.msra.mxu0 %v561_v32 }
 0x1b6   :  { %888 = vmatprep.subr.mxu0 %v560_v33 }
 0x1b7   :  { %889 = vmatpush3.msra.mxu0 %v560_v33 }
 0x1b8   :  { %890 = vmatprep.subr.mxu0 %v559_v34 }
 0x1b9   :  { %891 = vmatpush3.msra.mxu0 %v559_v34 }
 0x1ba   :  { %893 = vmatmul.mubr.msk.f32.vlgmr.msra.gmra.mxu0 %vm595_vm5, %v568_v35 }
 0x1bb   :  { %895 = vmatprep.mubr.msk.f32.mxu0 %vm595_vm5, %v569_v36 }
 0x1be   :  { %896 = vmatmul.mubr.msk.f32.gmra.mxu0 %vm595_vm5, %v570_v37 }
 0x27a   :  { %v894_v42 = vpop.f32.mrf.mxu0 }
 0x27b   :  { %v680_v43 = vadd.f32 %v894_v42, %v583_v39 }
 0x27c   :  { %v674_v44 = vpop.f32.mrf.mxu0 }
 0x27d   :  { %v675_v45 = vadd.f32 %v674_v44, %v578_v38  ;;  %v694_v48 = vmax.f32 %v680_v43, 0.0 }
 0x27e   :  { %v897_v47 = vpop.f32.mrf.mxu0 }
 0x27f   :  { %v693_v49 = vmax.f32 %v675_v45, 0.0  ;;  %v690_v50 = vadd.f32 %v897_v47, %v593_v41  ;;  %v722_v55 = vmul.f32 %v709_v51, %v694_v48 }
 0x280   :  { %v684_v52 = vpop.f32.mrf.mxu0 }
 0x281   :  { %v721_v53 = vmul.f32 %v704_v46, %v693_v49  ;;  %v685_v54 = vadd.f32 %v684_v52, %v588_v40  ;;  %v696_v56 = vmax.f32 %v690_v50, 0.0 }
 0x283   :  { %v695_v57 = vmax.f32 %v685_v54, 0.0  ;;  %v725_v59 = vadd.f32 %v722_v55, %v721_v53  ;;  %v724_v62 = vmul.f32 %v719_v61, %v696_v56 }
 0x285   :  { %v723_v60 = vmul.f32 %v714_v58, %v695_v57 }
 0x287   :  { %v726_v63 = vadd.f32 %v725_v59, %v723_v60 }
 0x289   :  { %v727_v0 = vadd.f32 %v726_v63, %v724_v62 }
 0x28b   :  { %v728_v1 = vrot.slane %v727_v0, 4 }
 0x28d   :  { %v729_v2 = vadd.f32 %v728_v1, %v727_v0 }
 0x28f   :  { %v730_v4 = vrot.slane %v729_v2, 2 }
 0x291   :  { %v731_v6 = vadd.f32 %v730_v4, %v729_v2 }
 0x293   :  { %v732_v8 = vrot.slane %v731_v6, 1 }
 0x295   :  { %v733_v10 = vadd.f32 %v732_v8, %v731_v6 }
 0x297   :  { %v744_v11 = vadd.f32 %v743_v9, %v733_v10 }
 0x299   :  { %745 = vst [vmem:[#allocation3] sm:$0x1] %v744_v11 }
 0x29a   :  { %914 = shalt.err (!%p911_p4)
}
 0x29b   :  { %755 = dma.vmem_to_hbm [thread:$0]  %s753_s23, 16, %s1161_s11, [#allocation4]  }
 0x29c   :  { %923 = dma.done.wait [#allocation4], 16  }
 0x29d   :  { %924 = vsyncadd [#allocation4], 4294967280 }
 0x29e   :  { %759 = vsyncpa [#allocation4], 1 }

</bundles_post_ra>
